<compile_context>
chip_gen: v7x
topology: tpu7x:2x2x1
jax: 0.10.0
libtpu: 0.0.40
codegen_flags: <defaults>
</compile_context>

<pallas_src>
import functools
import math

import jax
import jax.numpy as jnp
from jax import lax
from jax.experimental import pallas as pl
from jax.experimental.pallas import tpu as pltpu


# ----------------------------------------------------------------------------
# Counter-based hash PRNG (murmur3-style 32-bit finalizer), VPU-only ops.
# ----------------------------------------------------------------------------
def _mix32(x):
    x = x ^ (x >> 16)
    x = x * jnp.uint32(0x7FEB352D)
    x = x ^ (x >> 15)
    x = x * jnp.uint32(0x846CA68B)
    x = x ^ (x >> 16)
    return x


# ----------------------------------------------------------------------------
# Kernels
# ----------------------------------------------------------------------------
def _pe_add_kernel(x_ref, pe_ref, o_ref):
    # x_ref: (tb, ts, D)   pe_ref: (ts, D)   o_ref: (tb, ts, D)
    o_ref[...] = (x_ref[...] + pe_ref[...][None]).astype(o_ref.dtype)


def _pe_dropout_kernel(seed_ref, x_ref, pe_ref, o_ref, *, keep_prob, tb, ts,
                       seq_len, d_model):
    y = x_ref[...] + pe_ref[...][None]                     # promoted dtype

    # Unique global element id per element of this block.
    shape = x_ref.shape                                    # (tb, ts, D)
    b0 = pl.program_id(1) * tb                             # batch is inner axis
    s0 = pl.program_id(0) * ts                             # seq is outer axis
    bi = lax.broadcasted_iota(jnp.int32, shape, 0) + b0
    si = lax.broadcasted_iota(jnp.int32, shape, 1) + s0
    di = lax.broadcasted_iota(jnp.int32, shape, 2)
    gid = (bi * seq_len + si) * d_model + di               # wraps are harmless

    seed = seed_ref[0].astype(jnp.uint32)
    key = gid.astype(jnp.uint32) * jnp.uint32(0x9E3779B9) + seed
    bits = _mix32(key)

    # keep iff uniform-uint32 < keep_prob * 2^32   (static threshold)
    threshold = jnp.uint32(min(int(round(keep_prob * 2.0 ** 32)),
                               (1 << 32) - 1))
    keep = bits < threshold
    inv_keep = 1.0 / keep_prob
    y = jnp.where(keep, y * inv_keep, 0.0)

    o_ref[...] = y.astype(o_ref.dtype)


# ----------------------------------------------------------------------------
# Module buffer: sinusoidal positional-encoding table (same math as PyTorch)
# ----------------------------------------------------------------------------
def make_positional_encoding_table(d_model, max_len=5000, dtype=jnp.float32):
    if d_model <= 0:
        raise ValueError("d_model must be a positive integer.")
    position = jnp.arange(max_len, dtype=jnp.float32)[:, None]          # (L,1)
    div_term = jnp.exp(jnp.arange(0, d_model, 2, dtype=jnp.float32)
                       * (-math.log(10000.0) / d_model))                # (ceil(D/2),)
    pe = jnp.zeros((max_len, d_model), jnp.float32)
    pe = pe.at[:, 0::2].set(jnp.sin(position * div_term))
    if d_model > 1:
        n_odd = d_model // 2
        pe = pe.at[:, 1::2].set(jnp.cos(position * div_term[:n_odd]))
    return pe.astype(dtype)


# ----------------------------------------------------------------------------
# Forward wrapper
# ----------------------------------------------------------------------------
@functools.partial(jax.jit,
                   static_argnames=("dropout_p", "training", "block_bytes"))
def positional_encoding_1d(x, pe_table, seed=0, *, dropout_p=0.1,
                           training=False, block_bytes=2 << 20):
    """x: (B, S, D).  pe_table: (max_len, D).  Returns dropout(x + pe[:S])."""
    B, S, D = x.shape
    max_len, d_model = pe_table.shape
    if D != d_model:
        raise RuntimeError(
            f"The embedding dimension of input x ({D}) does not match the "
            f"d_model of positional encoding ({d_model}).")
    if S > max_len:
        raise RuntimeError("seq_len exceeds max_len of the PE table.")

    out_dtype = jnp.promote_types(x.dtype, pe_table.dtype)
    itemsize = x.dtype.itemsize

    # Seq tile: keep the pe block modest (<= ~512 KiB), multiple of 8 rows.
    rows = max(8, (512 * 1024) // (D * itemsize))
    ts = S if rows >= S else max(8, (rows // 8) * 8)
    # Batch tile: fill the x block up to ~block_bytes (~2 MiB default -> the
    # whole double-buffered footprint stays < v5e's 16 MiB scoped VMEM).
    tb = int(max(1, min(B, block_bytes // (ts * D * itemsize))))

    # Seq OUTER, batch INNER -> pe block index constant along the inner loop,
    # so Pallas reuses the resident pe block instead of re-DMAing it.
    grid = (pl.cdiv(S, ts), pl.cdiv(B, tb))

    x_spec = pl.BlockSpec((tb, ts, D), lambda s, b, *_: (b, s, 0))
    pe_spec = pl.BlockSpec((ts, D), lambda s, b, *_: (s, 0))
    o_spec = pl.BlockSpec((tb, ts, D), lambda s, b, *_: (b, s, 0))

    compiler_params = pltpu.CompilerParams(
        dimension_semantics=("parallel", "parallel"))
    out_shape = jax.ShapeDtypeStruct((B, S, D), out_dtype)

    apply_dropout = bool(training) and float(dropout_p) > 0.0
    keep_prob = 1.0 - float(dropout_p)
    if apply_dropout and keep_prob <= 0.0:
        raise ValueError("dropout_p must be < 1.0 in training mode.")

    if not apply_dropout:
        # Inference path: no seed / scalar prefetch at all.
        return pl.pallas_call(
            _pe_add_kernel,
            out_shape=out_shape,
            grid_spec=pltpu.PrefetchScalarGridSpec(
                num_scalar_prefetch=0, grid=grid,
                in_specs=[x_spec, pe_spec], out_specs=o_spec),
            compiler_params=compiler_params,
        )(x, pe_table)

    kernel = functools.partial(_pe_dropout_kernel, keep_prob=keep_prob,
                               tb=tb, ts=ts, seq_len=S, d_model=D)
    seed_arr = jnp.asarray(seed, dtype=jnp.int32).reshape(1)
    return pl.pallas_call(
        kernel,
        out_shape=out_shape,
        grid_spec=pltpu.PrefetchScalarGridSpec(
            num_scalar_prefetch=1,            # seed lands in SMEM
            grid=grid,
            in_specs=[x_spec, pe_spec], out_specs=o_spec),
        compiler_params=compiler_params,
    )(seed_arr, x, pe_table)


# ----------------------------------------------------------------------------
# Demo / self-check
# ----------------------------------------------------------------------------
if __name__ == "__main__":
    key = jax.random.PRNGKey(0)
    B, S, D = 4, 128, 128           # d_model multiple of 128 -> lane-dense out
    MAX_LEN = 512
    DROPOUT_P = 0.1
    KEEP = 1.0 - DROPOUT_P

    x = jax.random.normal(key, (B, S, D), jnp.float32)
    pe_table = make_positional_encoding_table(D, MAX_LEN)
    ref = x + pe_table[None, :S, :]

    # Eval mode (dropout inactive) -- must match x + pe.
    out = positional_encoding_1d(x, pe_table, dropout_p=DROPOUT_P,
                                 training=False)
    out = jax.block_until_ready(out)
    assert out.shape == (B, S, D), out.shape
    assert bool(jnp.allclose(out, ref, atol=1e-6, rtol=1e-6))

    # Training mode (fused inverted dropout via hash PRNG) -- sanity checks.
    out_tr = positional_encoding_1d(x, pe_table, jnp.int32(123),
                                    dropout_p=DROPOUT_P, training=True)
    out_tr = jax.block_until_ready(out_tr)
    assert out_tr.shape == (B, S, D)
    assert bool(jnp.all(jnp.isfinite(out_tr)))
    zero_frac = float(jnp.mean(out_tr == 0.0))
    assert 0.03 < zero_frac < 0.3, zero_frac          # ~= dropout_p = 0.1
    scaled_ref = ref * (1.0 / KEEP)
    kept_ok = (out_tr == 0.0) | (
        jnp.abs(out_tr - scaled_ref) <= 1e-5 * (1.0 + jnp.abs(scaled_ref)))
    assert bool(jnp.all(kept_ok))

    print("KERNEL_OK")
</pallas_src>

<mosaic_0001>
module attributes {stable_mosaic.version = 11 : i64} {
  func.func @_pe_add_kernel(%arg0: i32, %arg1: i32, %arg2: memref<4x128x128xf32, #tpu.memory_space<vmem>>, %arg3: memref<128x128xf32, #tpu.memory_space<vmem>>, %arg4: memref<4x128x128xf32, #tpu.memory_space<vmem>>) attributes {dimension_semantics = [#tpu.dimension_semantics<parallel>, #tpu.dimension_semantics<parallel>], iteration_bounds = array<i64: 1, 1>, scalar_prefetch = 0 : i64, scratch_operands = 0 : i64, tpu.core_type = #tpu.core_type<tc>, window_params = [{transform_indices = @transform_0, window_bounds = array<i64: 4, 128, 128>}, {transform_indices = @transform_1, window_bounds = array<i64: 128, 128>}, {transform_indices = @transform_2, window_bounds = array<i64: 4, 128, 128>}]} {
    %c0 = arith.constant 0 : index
    %c0_0 = arith.constant 0 : index
    %c0_1 = arith.constant 0 : index
    %0 = vector.load %arg2[%c0, %c0_0, %c0_1] : memref<4x128x128xf32, #tpu.memory_space<vmem>>, vector<4x128x128xf32>
    %c0_2 = arith.constant 0 : index
    %c0_3 = arith.constant 0 : index
    %1 = vector.load %arg3[%c0_2, %c0_3] : memref<128x128xf32, #tpu.memory_space<vmem>>, vector<128x128xf32>
    %2 = vector.shape_cast %1 : vector<128x128xf32> to vector<1x128x128xf32>
    %3 = vector.broadcast %2 : vector<1x128x128xf32> to vector<4x128x128xf32>
    %4 = arith.addf %0, %3 : vector<4x128x128xf32>
    %c0_4 = arith.constant 0 : index
    %c0_5 = arith.constant 0 : index
    %c0_6 = arith.constant 0 : index
    %5 = vector.load %arg4[%c0_4, %c0_5, %c0_6] : memref<4x128x128xf32, #tpu.memory_space<vmem>>, vector<4x128x128xf32>
    tpu.vector_store %arg4[%c0_4, %c0_5, %c0_6], %4 {strides = array<i32>} : memref<4x128x128xf32, #tpu.memory_space<vmem>>, vector<4x128x128xf32>,
    return
  }
  func.func @transform_0(%arg0: i32, %arg1: i32) -> (i32, i32, i32) {
    %c0_i32 = arith.constant 0 : i32
    %c0_i32_0 = arith.constant 0 : i32
    return %arg1, %arg0, %c0_i32 : i32, i32, i32
  }
  func.func @transform_1(%arg0: i32, %arg1: i32) -> (i32, i32) {
    %c0_i32 = arith.constant 0 : i32
    %c0_i32_0 = arith.constant 0 : i32
    return %arg0, %c0_i32 : i32, i32
  }
  func.func @transform_2(%arg0: i32, %arg1: i32) -> (i32, i32, i32) {
    %c0_i32 = arith.constant 0 : i32
    %c0_i32_0 = arith.constant 0 : i32
    return %arg1, %arg0, %c0_i32 : i32, i32, i32
  }
}

</mosaic_0001>

<bundles_post_ra>
// kernel: positional_encoding_1d.1
= control target key start
LH: loop header
LB: loop body
LE: loop exit
PB: predicated region body
PF: predicated region fallthrough
CT: control target
= control target key end

     0   :  { %7 = vsyncpa [#allocation3], 0  ;;  %s507_s0 = inlined_call_operand.hbm [shape: f32[4,128,128], index: 0, kind: input, shape index: {}]   ;;  %s508_s1 = inlined_call_operand.hbm [shape: f32[512,128], index: 1, kind: input, shape index: {}]   ;;  %s509_s2 = inlined_call_operand.hbm [shape: f32[4,128,128], index: 2, kind: output, shape index: {}]  }
   0x1   :  { %8 = vsyncpa [#allocation6], 0 }
   0x2   :  { %9 = vsyncpa [#allocation4], 0  ;;  %s343_s9 = smov [#allocation2]   ;;  %s271_s13 = scalar_lea.hbm %s507_s0, 8192 }
   0x3   :  { %s15_s10 = sshll.u32 %s343_s9, 4  ;;  %p272_p0 = scmp.ne.s32.totalorder %s507_s0, %s271_s13  ;;  %s16_s10 = int_to_ptr.vmem [resolvable:$true] %s15_s10 }
   0x4   :  { %p275_p1 = scmp.lt.u32.totalorder %s271_s13, %s507_s0 }
   0x6   :  { %p277_p2 = pnand %p275_p1, %p272_p0 }
   0x8   :  { %280 = shalt.err (!%p277_p2)
}
   0x9   :  { %s281_s18 = scalar_lea.vmem %s16_s10, 8192  ;;  %p286_p4 = scmp.lt.s32.totalorder %s16_s10, %s16_s10 }
   0xa   :  { %p282_p3 = scmp.ne.s32.totalorder %s16_s10, %s281_s18  ;;  %p287_p5 = scmp.lt.s32.totalorder %s281_s18, %s281_s18 }
   0xc   :  { %p288_p6 = por %p287_p5, %p286_p4 }
   0xe   :  { %p289_p7 = pnand %p288_p6, %p282_p3 }
  0x10   :  { %292 = shalt.err (!%p289_p7)
}
  0x11   :  { %s344_s19 = smov 128   ;;  %s345_s20 = smov 8  }
  0x12   :  { %21 = dma.hbm_to_vmem [thread:$0]  %s507_s0, 8192, %s16_s10, [#allocation3], %s344_s19, %s344_s19, %s345_s20  }
  0x13   :  { %s346_s23 = smov [#allocation5]   ;;  %s293_s27 = scalar_lea.hbm %s508_s1, 2048 }
  0x14   :  { %s27_s24 = sshll.u32 %s346_s23, 4  ;;  %p294_p8 = scmp.ne.s32.totalorder %s508_s1, %s293_s27  ;;  %s28_s24 = int_to_ptr.vmem [resolvable:$true] %s27_s24 }
  0x15   :  { %s295_s4 = scalar_lea.hbm %s508_s1, 8192  ;;  %p297_p10 = scmp.lt.u32.totalorder %s293_s27, %s508_s1 }
  0x16   :  { %p296_p9 = scmp.lt.u32.totalorder %s295_s4, %s293_s27 }
  0x18   :  { %p298_p11 = por %p297_p10, %p296_p9 }
  0x1a   :  { %p299_p12 = pnand %p298_p11, %p294_p8 }
  0x1c   :  { %302 = shalt.err (!%p299_p12)
}
  0x1d   :  { %s303_s0 = scalar_lea.vmem %s28_s24, 2048  ;;  %p308_p0 = scmp.lt.s32.totalorder %s28_s24, %s28_s24 }
  0x1e   :  { %p304_p13 = scmp.ne.s32.totalorder %s28_s24, %s303_s0  ;;  %p309_p1 = scmp.lt.s32.totalorder %s303_s0, %s303_s0 }
  0x20   :  { %p310_p2 = por %p309_p1, %p308_p0 }
  0x22   :  { %p311_p3 = pnand %p310_p2, %p304_p13 }
  0x24   :  { %314 = shalt.err (!%p311_p3)
}
  0x25   :  { %33 = dma.hbm_to_vmem [thread:$0]  %s508_s1, 2048, %s28_s24, [#allocation6], %s344_s19, %s344_s19, %s345_s20  }
  0x26   :  { %337 = dma.done.wait [#allocation3], 8192  }
  0x27   :  { %338 = vsyncadd [#allocation3], 4294959104 }
  0x28   :  { %339 = dma.done.wait [#allocation6], 2048  }
  0x29   :  { %340 = vsyncadd [#allocation6], 4294965248  ;;  %v40_v0 = vld [vmem:[#allocation2] sm:$0xff]  ;;  %v41_v2 = vld [vmem:[#allocation2 + $0x8] sm:$0xff]  ;;  %s347_s1 = smov [#allocation7]  }
  0x2a   :  { %v396_v1 = vld [vmem:[#allocation5] sm:$0xff]  ;;  %v399_v4 = vld [vmem:[#allocation5 + $0x8] sm:$0xff]  ;;  %v42_v5 = vld [vmem:[#allocation2 + $0x10] sm:$0xff]  ;;  %s253_s9 = sshll.u32 %s347_s1, 4  ;;  %s254_s9 = int_to_ptr.vmem [resolvable:$true] %s253_s9 }
  0x2b   :  { %v120_v3 = vadd.f32 %v396_v1, %v40_v0  ;;  %v401_v6 = vld [vmem:[#allocation5 + $0x10] sm:$0xff]  ;;  %v121_v7 = vadd.f32 %v399_v4, %v41_v2  ;;  %v43_v9 = vld [vmem:[#allocation2 + $0x18] sm:$0xff]  ;;  %v44_v11 = vld [vmem:[#allocation2 + $0x20] sm:$0xff]  ;;  %s315_s10 = scalar_lea.vmem %s254_s9, 8192  ;;  %p320_p5 = scmp.lt.s32.totalorder %s254_s9, %s254_s9 }
  0x2c   :  { %v122_v8 = vadd.f32 %v401_v6, %v42_v5  ;;  %v405_v10 = vld [vmem:[#allocation5 + $0x18] sm:$0xff]  ;;  %v408_v13 = vld [vmem:[#allocation5 + $0x20] sm:$0xff]  ;;  %v45_v14 = vld [vmem:[#allocation2 + $0x28] sm:$0xff]  ;;  %p316_p4 = scmp.ne.s32.totalorder %s254_s9, %s315_s10  ;;  %p321_p6 = scmp.lt.s32.totalorder %s315_s10, %s315_s10 }
  0x2d   :  { %184 = vst [vmem:[#allocation7] sm:$0xff] %v120_v3  ;;  %v123_v12 = vadd.f32 %v405_v10, %v43_v9  ;;  %v410_v15 = vld [vmem:[#allocation5 + $0x28] sm:$0xff]  ;;  %185 = vst [vmem:[#allocation7 + $0x8] sm:$0xff] %v121_v7  ;;  %v124_v16 = vadd.f32 %v408_v13, %v44_v11  ;;  %v46_v18 = vld [vmem:[#allocation2 + $0x30] sm:$0xff] }
  0x2e   :  { %186 = vst [vmem:[#allocation7 + $0x10] sm:$0xff] %v122_v8  ;;  %v125_v17 = vadd.f32 %v410_v15, %v45_v14  ;;  %v414_v19 = vld [vmem:[#allocation5 + $0x30] sm:$0xff]  ;;  %v47_v20 = vld [vmem:[#allocation2 + $0x38] sm:$0xff]  ;;  %v48_v23 = vld [vmem:[#allocation2 + $0x40] sm:$0xff]  ;;  %p322_p7 = por %p321_p6, %p320_p5 }
  0x2f   :  { %187 = vst [vmem:[#allocation7 + $0x18] sm:$0xff] %v123_v12  ;;  %v126_v21 = vadd.f32 %v414_v19, %v46_v18  ;;  %v417_v22 = vld [vmem:[#allocation5 + $0x38] sm:$0xff]  ;;  %v419_v24 = vld [vmem:[#allocation5 + $0x40] sm:$0xff]  ;;  %188 = vst [vmem:[#allocation7 + $0x20] sm:$0xff] %v124_v16 }
  0x30   :  { %189 = vst [vmem:[#allocation7 + $0x28] sm:$0xff] %v125_v17  ;;  %v127_v25 = vadd.f32 %v417_v22, %v47_v20  ;;  %v128_v26 = vadd.f32 %v419_v24, %v48_v23  ;;  %v49_v27 = vld [vmem:[#allocation2 + $0x48] sm:$0xff]  ;;  %v50_v29 = vld [vmem:[#allocation2 + $0x50] sm:$0xff]  ;;  %v51_v32 = vld [vmem:[#allocation2 + $0x58] sm:$0xff]  ;;  %p323_p8 = pnand %p322_p7, %p316_p4 }
  0x31   :  { %v423_v28 = vld [vmem:[#allocation5 + $0x48] sm:$0xff]  ;;  %190 = vst [vmem:[#allocation7 + $0x30] sm:$0xff] %v126_v21  ;;  %v426_v31 = vld [vmem:[#allocation5 + $0x50] sm:$0xff]  ;;  %v428_v33 = vld [vmem:[#allocation5 + $0x58] sm:$0xff] }
  0x32   :  { %v129_v30 = vadd.f32 %v423_v28, %v49_v27  ;;  %191 = vst [vmem:[#allocation7 + $0x38] sm:$0xff] %v127_v25  ;;  %192 = vst [vmem:[#allocation7 + $0x40] sm:$0xff] %v128_v26  ;;  %v130_v34 = vadd.f32 %v426_v31, %v50_v29  ;;  %v131_v35 = vadd.f32 %v428_v33, %v51_v32  ;;  %v52_v36 = vld [vmem:[#allocation2 + $0x60] sm:$0xff]  ;;  %v53_v38 = vld [vmem:[#allocation2 + $0x68] sm:$0xff] }
  0x33   :  { %v432_v37 = vld [vmem:[#allocation5 + $0x60] sm:$0xff]  ;;  %v435_v40 = vld [vmem:[#allocation5 + $0x68] sm:$0xff]  ;;  %v54_v41 = vld [vmem:[#allocation2 + $0x70] sm:$0xff] }
  0x34   :  { %193 = vst [vmem:[#allocation7 + $0x48] sm:$0xff] %v129_v30  ;;  %v132_v39 = vadd.f32 %v432_v37, %v52_v36  ;;  %v437_v42 = vld [vmem:[#allocation5 + $0x70] sm:$0xff]  ;;  %194 = vst [vmem:[#allocation7 + $0x50] sm:$0xff] %v130_v34  ;;  %v133_v43 = vadd.f32 %v435_v40, %v53_v38  ;;  %v55_v45 = vld [vmem:[#allocation2 + $0x78] sm:$0xff] }
  0x35   :  { %195 = vst [vmem:[#allocation7 + $0x58] sm:$0xff] %v131_v35  ;;  %v134_v44 = vadd.f32 %v437_v42, %v54_v41  ;;  %v441_v46 = vld [vmem:[#allocation5 + $0x78] sm:$0xff]  ;;  %v56_v47 = vld [vmem:[#allocation2 + $0x80] sm:$0xff]  ;;  %v57_v50 = vld [vmem:[#allocation2 + $0x88] sm:$0xff] }
  0x36   :  { %196 = vst [vmem:[#allocation7 + $0x60] sm:$0xff] %v132_v39  ;;  %v135_v48 = vadd.f32 %v441_v46, %v55_v45  ;;  %v136_v49 = vadd.f32 %v396_v1, %v56_v47  ;;  %v58_v51 = vld [vmem:[#allocation2 + $0x90] sm:$0xff]  ;;  %v59_v52 = vld [vmem:[#allocation2 + $0x98] sm:$0xff]  ;;  %197 = vst [vmem:[#allocation7 + $0x68] sm:$0xff] %v133_v43  ;;  %v137_v53 = vadd.f32 %v399_v4, %v57_v50 }
  0x37   :  { %198 = vst [vmem:[#allocation7 + $0x70] sm:$0xff] %v134_v44  ;;  %v138_v54 = vadd.f32 %v401_v6, %v58_v51  ;;  %v139_v55 = vadd.f32 %v405_v10, %v59_v52  ;;  %v60_v56 = vld [vmem:[#allocation2 + $0xa0] sm:$0xff]  ;;  %v61_v57 = vld [vmem:[#allocation2 + $0xa8] sm:$0xff]  ;;  %v62_v58 = vld [vmem:[#allocation2 + $0xb0] sm:$0xff] }
  0x38   :  { %199 = vst [vmem:[#allocation7 + $0x78] sm:$0xff] %v135_v48  ;;  %200 = vst [vmem:[#allocation7 + $0x80] sm:$0xff] %v136_v49  ;;  %v140_v59 = vadd.f32 %v408_v13, %v60_v56  ;;  %v141_v60 = vadd.f32 %v410_v15, %v61_v57  ;;  %v142_v61 = vadd.f32 %v414_v19, %v62_v58  ;;  %v63_v62 = vld [vmem:[#allocation2 + $0xb8] sm:$0xff]  ;;  %v64_v63 = vld [vmem:[#allocation2 + $0xc0] sm:$0xff] }
  0x39   :  { %v65_v0 = vld [vmem:[#allocation2 + $0xc8] sm:$0xff]  ;;  %201 = vst [vmem:[#allocation7 + $0x88] sm:$0xff] %v137_v53  ;;  %202 = vst [vmem:[#allocation7 + $0x90] sm:$0xff] %v138_v54  ;;  %v143_v2 = vadd.f32 %v417_v22, %v63_v62  ;;  %v144_v3 = vadd.f32 %v419_v24, %v64_v63  ;;  %v66_v7 = vld [vmem:[#allocation2 + $0xd0] sm:$0xff] }
  0x3a   :  { %203 = vst [vmem:[#allocation7 + $0x98] sm:$0xff] %v139_v55  ;;  %v145_v5 = vadd.f32 %v423_v28, %v65_v0  ;;  %v67_v8 = vld [vmem:[#allocation2 + $0xd8] sm:$0xff]  ;;  %v68_v9 = vld [vmem:[#allocation2 + $0xe0] sm:$0xff]  ;;  %204 = vst [vmem:[#allocation7 + $0xa0] sm:$0xff] %v140_v59  ;;  %v146_v11 = vadd.f32 %v426_v31, %v66_v7 }
  0x3b   :  { %205 = vst [vmem:[#allocation7 + $0xa8] sm:$0xff] %v141_v60  ;;  %206 = vst [vmem:[#allocation7 + $0xb0] sm:$0xff] %v142_v61  ;;  %v147_v12 = vadd.f32 %v428_v33, %v67_v8  ;;  %v148_v14 = vadd.f32 %v432_v37, %v68_v9  ;;  %v69_v16 = vld [vmem:[#allocation2 + $0xe8] sm:$0xff]  ;;  %v70_v17 = vld [vmem:[#allocation2 + $0xf0] sm:$0xff] }
  0x3c   :  { %v71_v18 = vld [vmem:[#allocation2 + $0xf8] sm:$0xff]  ;;  %207 = vst [vmem:[#allocation7 + $0xb8] sm:$0xff] %v143_v2  ;;  %208 = vst [vmem:[#allocation7 + $0xc0] sm:$0xff] %v144_v3  ;;  %v149_v20 = vadd.f32 %v435_v40, %v69_v16  ;;  %v150_v21 = vadd.f32 %v437_v42, %v70_v17  ;;  %v72_v25 = vld [vmem:[#allocation2 + $0x100] sm:$0xff] }
  0x3d   :  { %209 = vst [vmem:[#allocation7 + $0xc8] sm:$0xff] %v145_v5  ;;  %v151_v23 = vadd.f32 %v441_v46, %v71_v18  ;;  %v73_v26 = vld [vmem:[#allocation2 + $0x108] sm:$0xff]  ;;  %v74_v27 = vld [vmem:[#allocation2 + $0x110] sm:$0xff]  ;;  %210 = vst [vmem:[#allocation7 + $0xd0] sm:$0xff] %v146_v11  ;;  %v152_v29 = vadd.f32 %v396_v1, %v72_v25 }
  0x3e   :  { %211 = vst [vmem:[#allocation7 + $0xd8] sm:$0xff] %v147_v12  ;;  %212 = vst [vmem:[#allocation7 + $0xe0] sm:$0xff] %v148_v14  ;;  %v153_v30 = vadd.f32 %v399_v4, %v73_v26  ;;  %v154_v32 = vadd.f32 %v401_v6, %v74_v27  ;;  %v75_v34 = vld [vmem:[#allocation2 + $0x118] sm:$0xff]  ;;  %v76_v35 = vld [vmem:[#allocation2 + $0x120] sm:$0xff] }
  0x3f   :  { %v77_v36 = vld [vmem:[#allocation2 + $0x128] sm:$0xff]  ;;  %213 = vst [vmem:[#allocation7 + $0xe8] sm:$0xff] %v149_v20  ;;  %214 = vst [vmem:[#allocation7 + $0xf0] sm:$0xff] %v150_v21  ;;  %v155_v38 = vadd.f32 %v405_v10, %v75_v34  ;;  %v156_v39 = vadd.f32 %v408_v13, %v76_v35  ;;  %v78_v43 = vld [vmem:[#allocation2 + $0x130] sm:$0xff] }
  0x40   :  { %215 = vst [vmem:[#allocation7 + $0xf8] sm:$0xff] %v151_v23  ;;  %v157_v41 = vadd.f32 %v410_v15, %v77_v36  ;;  %v79_v44 = vld [vmem:[#allocation2 + $0x138] sm:$0xff]  ;;  %v80_v45 = vld [vmem:[#allocation2 + $0x140] sm:$0xff]  ;;  %216 = vst [vmem:[#allocation7 + $0x100] sm:$0xff] %v152_v29  ;;  %v158_v47 = vadd.f32 %v414_v19, %v78_v43 }
  0x41   :  { %217 = vst [vmem:[#allocation7 + $0x108] sm:$0xff] %v153_v30  ;;  %218 = vst [vmem:[#allocation7 + $0x110] sm:$0xff] %v154_v32  ;;  %v159_v48 = vadd.f32 %v417_v22, %v79_v44  ;;  %v160_v49 = vadd.f32 %v419_v24, %v80_v45  ;;  %v81_v50 = vld [vmem:[#allocation2 + $0x148] sm:$0xff]  ;;  %v82_v51 = vld [vmem:[#allocation2 + $0x150] sm:$0xff] }
  0x42   :  { %v83_v52 = vld [vmem:[#allocation2 + $0x158] sm:$0xff]  ;;  %219 = vst [vmem:[#allocation7 + $0x118] sm:$0xff] %v155_v38  ;;  %220 = vst [vmem:[#allocation7 + $0x120] sm:$0xff] %v156_v39  ;;  %v161_v53 = vadd.f32 %v423_v28, %v81_v50  ;;  %v162_v54 = vadd.f32 %v426_v31, %v82_v51  ;;  %v84_v56 = vld [vmem:[#allocation2 + $0x160] sm:$0xff] }
  0x43   :  { %221 = vst [vmem:[#allocation7 + $0x128] sm:$0xff] %v157_v41  ;;  %v163_v55 = vadd.f32 %v428_v33, %v83_v52  ;;  %v85_v57 = vld [vmem:[#allocation2 + $0x168] sm:$0xff]  ;;  %v86_v58 = vld [vmem:[#allocation2 + $0x170] sm:$0xff]  ;;  %222 = vst [vmem:[#allocation7 + $0x130] sm:$0xff] %v158_v47  ;;  %v164_v59 = vadd.f32 %v432_v37, %v84_v56 }
  0x44   :  { %223 = vst [vmem:[#allocation7 + $0x138] sm:$0xff] %v159_v48  ;;  %224 = vst [vmem:[#allocation7 + $0x140] sm:$0xff] %v160_v49  ;;  %v165_v60 = vadd.f32 %v435_v40, %v85_v57  ;;  %v166_v61 = vadd.f32 %v437_v42, %v86_v58  ;;  %v87_v62 = vld [vmem:[#allocation2 + $0x178] sm:$0xff]  ;;  %v88_v63 = vld [vmem:[#allocation2 + $0x180] sm:$0xff] }
  0x45   :  { %v89_v0 = vld [vmem:[#allocation2 + $0x188] sm:$0xff]  ;;  %225 = vst [vmem:[#allocation7 + $0x148] sm:$0xff] %v161_v53  ;;  %226 = vst [vmem:[#allocation7 + $0x150] sm:$0xff] %v162_v54  ;;  %v167_v2 = vadd.f32 %v441_v46, %v87_v62  ;;  %v168_v3 = vadd.f32 %v396_v1, %v88_v63  ;;  %v90_v7 = vld [vmem:[#allocation2 + $0x190] sm:$0xff] }
  0x46   :  { %227 = vst [vmem:[#allocation7 + $0x158] sm:$0xff] %v163_v55  ;;  %v169_v5 = vadd.f32 %v399_v4, %v89_v0  ;;  %v91_v8 = vld [vmem:[#allocation2 + $0x198] sm:$0xff]  ;;  %v92_v9 = vld [vmem:[#allocation2 + $0x1a0] sm:$0xff]  ;;  %228 = vst [vmem:[#allocation7 + $0x160] sm:$0xff] %v164_v59  ;;  %v170_v11 = vadd.f32 %v401_v6, %v90_v7 }
  0x47   :  { %229 = vst [vmem:[#allocation7 + $0x168] sm:$0xff] %v165_v60  ;;  %230 = vst [vmem:[#allocation7 + $0x170] sm:$0xff] %v166_v61  ;;  %v171_v12 = vadd.f32 %v405_v10, %v91_v8  ;;  %v172_v14 = vadd.f32 %v408_v13, %v92_v9  ;;  %v93_v16 = vld [vmem:[#allocation2 + $0x1a8] sm:$0xff]  ;;  %v94_v17 = vld [vmem:[#allocation2 + $0x1b0] sm:$0xff] }
  0x48   :  { %v95_v18 = vld [vmem:[#allocation2 + $0x1b8] sm:$0xff]  ;;  %231 = vst [vmem:[#allocation7 + $0x178] sm:$0xff] %v167_v2  ;;  %232 = vst [vmem:[#allocation7 + $0x180] sm:$0xff] %v168_v3  ;;  %v173_v1 = vadd.f32 %v410_v15, %v93_v16  ;;  %v174_v4 = vadd.f32 %v414_v19, %v94_v17  ;;  %v96_v21 = vld [vmem:[#allocation2 + $0x1c0] sm:$0xff] }
  0x49   :  { %233 = vst [vmem:[#allocation7 + $0x188] sm:$0xff] %v169_v5  ;;  %v175_v20 = vadd.f32 %v417_v22, %v95_v18  ;;  %v97_v23 = vld [vmem:[#allocation2 + $0x1c8] sm:$0xff]  ;;  %v98_v25 = vld [vmem:[#allocation2 + $0x1d0] sm:$0xff]  ;;  %234 = vst [vmem:[#allocation7 + $0x190] sm:$0xff] %v170_v11  ;;  %v176_v6 = vadd.f32 %v419_v24, %v96_v21 }
  0x4a   :  { %235 = vst [vmem:[#allocation7 + $0x198] sm:$0xff] %v171_v12  ;;  %236 = vst [vmem:[#allocation7 + $0x1a0] sm:$0xff] %v172_v14  ;;  %v177_v10 = vadd.f32 %v423_v28, %v97_v23  ;;  %v178_v13 = vadd.f32 %v426_v31, %v98_v25  ;;  %v99_v26 = vld [vmem:[#allocation2 + $0x1d8] sm:$0xff]  ;;  %v100_v15 = vld [vmem:[#allocation2 + $0x1e0] sm:$0xff] }
  0x4b   :  { %v101_v27 = vld [vmem:[#allocation2 + $0x1e8] sm:$0xff]  ;;  %237 = vst [vmem:[#allocation7 + $0x1a8] sm:$0xff] %v173_v1  ;;  %238 = vst [vmem:[#allocation7 + $0x1b0] sm:$0xff] %v174_v4  ;;  %v179_v19 = vadd.f32 %v428_v33, %v99_v26  ;;  %v180_v22 = vadd.f32 %v432_v37, %v100_v15  ;;  %v102_v30 = vld [vmem:[#allocation2 + $0x1f0] sm:$0xff] }
  0x4c   :  { %239 = vst [vmem:[#allocation7 + $0x1b8] sm:$0xff] %v175_v20  ;;  %v181_v29 = vadd.f32 %v435_v40, %v101_v27  ;;  %v103_v32 = vld [vmem:[#allocation2 + $0x1f8] sm:$0xff]  ;;  %240 = vst [vmem:[#allocation7 + $0x1c0] sm:$0xff] %v176_v6  ;;  %v182_v24 = vadd.f32 %v437_v42, %v102_v30 }
  0x4d   :  { %241 = vst [vmem:[#allocation7 + $0x1c8] sm:$0xff] %v177_v10  ;;  %242 = vst [vmem:[#allocation7 + $0x1d0] sm:$0xff] %v178_v13  ;;  %v183_v28 = vadd.f32 %v441_v46, %v103_v32 }
  0x4e   :  { %243 = vst [vmem:[#allocation7 + $0x1d8] sm:$0xff] %v179_v19  ;;  %244 = vst [vmem:[#allocation7 + $0x1e0] sm:$0xff] %v180_v22 }
  0x4f   :  { %245 = vst [vmem:[#allocation7 + $0x1e8] sm:$0xff] %v181_v29  ;;  %246 = vst [vmem:[#allocation7 + $0x1f0] sm:$0xff] %v182_v24 }
  0x50   :  { %247 = vst [vmem:[#allocation7 + $0x1f8] sm:$0xff] %v183_v28 }
  0x51   :  { %326 = shalt.err (!%p323_p8)
}
  0x52   :  { %s327_s13 = scalar_lea.hbm %s509_s2, 8192 }
  0x53   :  { %p328_p9 = scmp.ne.s32.totalorder %s509_s2, %s327_s13  ;;  %p331_p10 = scmp.lt.u32.totalorder %s327_s13, %s509_s2 }
  0x55   :  { %p333_p11 = pnand %p331_p10, %p328_p9 }
  0x57   :  { %336 = shalt.err (!%p333_p11)
}
  0x58   :  { %259 = dma.vmem_to_hbm [thread:$0]  %s254_s9, 8192, %s509_s2, [#allocation4], %s344_s19, %s344_s19, %s345_s20  }
  0x59   :  { %341 = dma.done.wait [#allocation4], 8192  }
  0x5a   :  { %342 = vsyncadd [#allocation4], 4294959104 }
  0x5b   :  { %263 = vsyncpa [#allocation3], 1 }
  0x5c   :  { %264 = vsyncpa [#allocation6], 1 }
  0x5d   :  { %265 = vsyncpa [#allocation4], 1 }

</bundles_post_ra>
